<compile_context>
chip_gen: v5e
topology: v5e:2x2
jax: 0.10.0
libtpu: 0.0.40
codegen_flags: <defaults>
</compile_context>

<pallas_src>
from functools import partial

import jax
import jax.numpy as jnp
from jax.experimental import pallas as pl
from jax.experimental.pallas import tpu as pltpu

INPUT_DIM = 3
NUM_HIDDEN_LAYERS = 8
HIDDEN_DIM = 32
OUTPUT_DIM = 1


def mlp_kernel(x_ref, w_in_ref, b_in_ref, w_h_ref, b_h_ref, w_out_ref, b_out_ref, o_ref,
               *, carry_bf16: bool):
    # x_ref:     (INPUT_DIM, TB)               bf16  -- batch in the lane dim
    # w_in_ref:  (HIDDEN_DIM, INPUT_DIM)       f32   -- PyTorch (out, in) layout
    # b_in_ref:  (HIDDEN_DIM, 1)               f32
    # w_h_ref:   (L-1, HIDDEN_DIM, HIDDEN_DIM) bf16  -- (out, in) layout: h_new = W @ h
    # b_h_ref:   (L-1, HIDDEN_DIM, 1)          f32
    # w_out_ref: (HIDDEN_DIM, OUTPUT_DIM)      f32
    # b_out_ref: (OUTPUT_DIM, 1)               f32
    # o_ref:     (OUTPUT_DIM, TB)              f32
    tb = x_ref.shape[-1]
    xT = x_ref[...]                       # (3, TB) bf16
    w_in = w_in_ref[...]                  # (32, 3) f32

    # First layer (K=3): hoisted sublane broadcasts of the 3 input rows, then VPU FMAs.
    x_rows = [jnp.broadcast_to(xT[k:k + 1, :], (HIDDEN_DIM, tb)) for k in range(INPUT_DIM)]
    h = b_in_ref[...]                     # (32, 1) -> broadcasts over lanes below
    for k in range(INPUT_DIM):
        h = h + w_in[:, k:k + 1] * x_rows[k]          # f32 * bf16 -> f32 (32, TB)
    if carry_bf16:
        h = jnp.maximum(h.astype(jnp.bfloat16), 0.0)  # ReLU commutes with the downcast
    else:
        h = jnp.maximum(h, 0.0)

    # Hidden layers: bf16 MXU matmuls with f32 accumulation, lane-dense N=TB.
    for i in range(NUM_HIDDEN_LAYERS - 1):
        lhs = h if carry_bf16 else h.astype(jnp.bfloat16)
        a = jnp.dot(w_h_ref[i], lhs, preferred_element_type=jnp.float32) + b_h_ref[i]
        last_hidden = i == NUM_HIDDEN_LAYERS - 2
        if carry_bf16 and not last_hidden:
            h = jnp.maximum(a.astype(jnp.bfloat16), 0.0)   # bias/ReLU on bf16 vregs
        else:
            h = jnp.maximum(a, 0.0)       # keep final activation in f32 for the output layer

    # Output layer (N=1): weighted sublane reduction on the XLU, then sigmoid (EUP).
    y = jnp.sum(w_out_ref[...] * h, axis=0, keepdims=True) + b_out_ref[...]   # (1, TB) f32
    o_ref[...] = jax.nn.sigmoid(y)


def _tile_and_steps(B, tb, min_tiles=2):
    """Lane-aligned batch tile and an even (>=2) number of grid steps (v7x TC balance)."""
    tb = max(128, (tb // 128) * 128)                  # lane-tiling guard (multiple of 128)
    lane_groups = pl.cdiv(B, 128)                     # 128-lane groups needed to cover B
    tiles = max(min_tiles, pl.cdiv(lane_groups * 128, tb))
    tiles = pl.cdiv(tiles, min_tiles) * min_tiles     # even tile count
    TB = pl.cdiv(lane_groups, tiles) * 128            # per-tile lanes (multiple of 128, <= tb)
    return TB, tiles


@partial(jax.jit, static_argnames=("tb", "carry_bf16"))
def mlp_forward(x, params, *, tb=8192, carry_bf16=True):
    B = x.shape[0]
    TB, tiles = _tile_and_steps(B, tb)
    B_pad = TB * tiles

    # Transpose + zero-pad fused by XLA inside this jit; carried as bf16 to halve HBM traffic.
    xT = jnp.pad(x.T.astype(jnp.bfloat16), ((0, 0), (0, B_pad - B)))

    const2 = lambda i: (0, 0)
    const3 = lambda i: (0, 0, 0)
    out_t = pl.pallas_call(
        partial(mlp_kernel, carry_bf16=carry_bf16),
        out_shape=jax.ShapeDtypeStruct((OUTPUT_DIM, B_pad), jnp.float32),
        grid=(tiles,),
        in_specs=[
            pl.BlockSpec((INPUT_DIM, TB), lambda i: (0, i)),
            pl.BlockSpec((HIDDEN_DIM, INPUT_DIM), const2),
            pl.BlockSpec((HIDDEN_DIM, 1), const2),
            pl.BlockSpec((NUM_HIDDEN_LAYERS - 1, HIDDEN_DIM, HIDDEN_DIM), const3),
            pl.BlockSpec((NUM_HIDDEN_LAYERS - 1, HIDDEN_DIM, 1), const3),
            pl.BlockSpec((HIDDEN_DIM, OUTPUT_DIM), const2),
            pl.BlockSpec((OUTPUT_DIM, 1), const2),
        ],
        out_specs=pl.BlockSpec((OUTPUT_DIM, TB), lambda i: (0, i)),
        compiler_params=pltpu.CompilerParams(
            dimension_semantics=("parallel",),   # batch tiles shard across TCs (v7x megacore)
        ),
    )(
        xT,
        params["w_in_t"], params["b_in"],
        params["w_h_t"], params["b_h"],
        params["w_out"], params["b_out"],
    )
    return out_t[:, :B].T   # (B, OUTPUT_DIM)


def init_params(key):
    # Deterministic synthetic parameters (uniform, akin to PyTorch default Linear init scale).
    ks = jax.random.split(key, 6)

    def uni(k, shape, fan_in):
        bound = 1.0 / jnp.sqrt(jnp.float32(fan_in))
        return jax.random.uniform(k, shape, jnp.float32, -bound, bound)

    return {
        # Stored in PyTorch (out_features, in_features) layout; kernel computes h_new = W @ h.
        "w_in_t": uni(ks[0], (HIDDEN_DIM, INPUT_DIM), INPUT_DIM),
        "b_in": uni(ks[1], (HIDDEN_DIM, 1), INPUT_DIM),
        "w_h_t": uni(ks[2], (NUM_HIDDEN_LAYERS - 1, HIDDEN_DIM, HIDDEN_DIM),
                     HIDDEN_DIM).astype(jnp.bfloat16),
        "b_h": uni(ks[3], (NUM_HIDDEN_LAYERS - 1, HIDDEN_DIM, 1), HIDDEN_DIM),
        "w_out": uni(ks[4], (HIDDEN_DIM, OUTPUT_DIM), HIDDEN_DIM),
        "b_out": uni(ks[5], (OUTPUT_DIM, 1), HIDDEN_DIM),
    }


def reference_forward(x, params):
    """Pure-JAX reference with the same bf16-input / bf16-weight / f32-accumulate numerics."""
    hp = jax.lax.Precision.HIGHEST
    xT = x.T.astype(jnp.bfloat16).astype(jnp.float32)   # kernel carries the input in bf16
    hT = jnp.matmul(params["w_in_t"], xT, precision=hp) + params["b_in"]
    hT = jnp.maximum(hT, 0.0)
    for i in range(NUM_HIDDEN_LAYERS - 1):
        w = params["w_h_t"][i].astype(jnp.float32)
        h_bf = hT.astype(jnp.bfloat16).astype(jnp.float32)
        hT = jnp.maximum(jnp.matmul(w, h_bf, precision=hp) + params["b_h"][i], 0.0)
    yT = jnp.sum(params["w_out"] * hT, axis=0, keepdims=True) + params["b_out"]
    return jax.nn.sigmoid(yT).T


if __name__ == "__main__":
    key = jax.random.PRNGKey(0)
    k_param, k_x, k_x2 = jax.random.split(key, 3)
    params = init_params(k_param)

    # Small batch: padded to two 128-lane tiles (even grid -> both v7x TensorCores get a step).
    B = 8
    x = jax.random.normal(k_x, (B, INPUT_DIM), dtype=jnp.float32)
    out = jax.block_until_ready(mlp_forward(x, params))
    ref = reference_forward(x, params)
    assert out.shape == (B, OUTPUT_DIM)
    assert jnp.allclose(out, ref, atol=1e-3, rtol=1e-3), float(jnp.max(jnp.abs(out - ref)))

    # Ragged batch with a small caller tile -> several pipelined grid steps (even count).
    B2 = 300
    x2 = jax.random.normal(k_x2, (B2, INPUT_DIM), dtype=jnp.float32)
    out2 = jax.block_until_ready(mlp_forward(x2, params, tb=128))
    ref2 = reference_forward(x2, params)
    assert out2.shape == (B2, OUTPUT_DIM)
    assert jnp.allclose(out2, ref2, atol=1e-3, rtol=1e-3), float(jnp.max(jnp.abs(out2 - ref2)))

    # f32-elementwise path (preferred on v5e, which has no bf16 VALU); same numerics.
    out3 = jax.block_until_ready(mlp_forward(x2, params, carry_bf16=False))
    assert jnp.allclose(out3, ref2, atol=1e-3, rtol=1e-3), float(jnp.max(jnp.abs(out3 - ref2)))

    print("KERNEL_OK")
</pallas_src>

<mosaic_0001>
module attributes {stable_mosaic.version = 11 : i64} {
  func.func @mlp_kernel(%arg0: i32, %arg1: memref<3x128xbf16, #tpu.memory_space<vmem>>, %arg2: memref<32x3xf32, #tpu.memory_space<vmem>>, %arg3: memref<32x1xf32, #tpu.memory_space<vmem>>, %arg4: memref<7x32x32xbf16, #tpu.memory_space<vmem>>, %arg5: memref<7x32x1xf32, #tpu.memory_space<vmem>>, %arg6: memref<32x1xf32, #tpu.memory_space<vmem>>, %arg7: memref<1x1xf32, #tpu.memory_space<vmem>>, %arg8: memref<1x128xf32, #tpu.memory_space<vmem>>) attributes {dimension_semantics = [#tpu.dimension_semantics<parallel>], iteration_bounds = array<i64: 2>, scalar_prefetch = 0 : i64, scratch_operands = 0 : i64, tpu.core_type = #tpu.core_type<tc>, window_params = [{transform_indices = @transform_0, window_bounds = array<i64: 3, 128>}, {pipeline_mode = #tpu.pipeline_mode<synchronous>, transform_indices = @transform_1, window_bounds = array<i64: 32, 3>}, {pipeline_mode = #tpu.pipeline_mode<synchronous>, transform_indices = @transform_2, window_bounds = array<i64: 32, 1>}, {pipeline_mode = #tpu.pipeline_mode<synchronous>, transform_indices = @transform_3, window_bounds = array<i64: 7, 32, 32>}, {pipeline_mode = #tpu.pipeline_mode<synchronous>, transform_indices = @transform_4, window_bounds = array<i64: 7, 32, 1>}, {pipeline_mode = #tpu.pipeline_mode<synchronous>, transform_indices = @transform_5, window_bounds = array<i64: 32, 1>}, {pipeline_mode = #tpu.pipeline_mode<synchronous>, transform_indices = @transform_6, window_bounds = array<i64: 1, 1>}, {transform_indices = @transform_7, window_bounds = array<i64: 1, 128>}]} {
    %c0 = arith.constant 0 : index
    %c0_0 = arith.constant 0 : index
    %0 = vector.load %arg1[%c0, %c0_0] : memref<3x128xbf16, #tpu.memory_space<vmem>>, vector<3x128xbf16>
    %c0_1 = arith.constant 0 : index
    %c0_2 = arith.constant 0 : index
    %1 = vector.load %arg2[%c0_1, %c0_2] : memref<32x3xf32, #tpu.memory_space<vmem>>, vector<32x3xf32>
    %2 = vector.extract_strided_slice %0 {offsets = [0, 0], sizes = [1, 128], strides = [1, 1]} : vector<3x128xbf16> to vector<1x128xbf16>
    %3 = vector.shape_cast %2 : vector<1x128xbf16> to vector<1x128xbf16>
    %4 = vector.broadcast %3 : vector<1x128xbf16> to vector<32x128xbf16>
    %5 = vector.extract_strided_slice %0 {offsets = [1, 0], sizes = [1, 128], strides = [1, 1]} : vector<3x128xbf16> to vector<1x128xbf16>
    %6 = vector.shape_cast %5 : vector<1x128xbf16> to vector<1x128xbf16>
    %7 = vector.broadcast %6 : vector<1x128xbf16> to vector<32x128xbf16>
    %8 = vector.extract_strided_slice %0 {offsets = [2, 0], sizes = [1, 128], strides = [1, 1]} : vector<3x128xbf16> to vector<1x128xbf16>
    %9 = vector.shape_cast %8 : vector<1x128xbf16> to vector<1x128xbf16>
    %10 = vector.broadcast %9 : vector<1x128xbf16> to vector<32x128xbf16>
    %c0_3 = arith.constant 0 : index
    %c0_4 = arith.constant 0 : index
    %11 = vector.load %arg3[%c0_3, %c0_4] : memref<32x1xf32, #tpu.memory_space<vmem>>, vector<32x1xf32>
    %12 = vector.extract_strided_slice %1 {offsets = [0, 0], sizes = [32, 1], strides = [1, 1]} : vector<32x3xf32> to vector<32x1xf32>
    %13 = arith.extf %4 : vector<32x128xbf16> to vector<32x128xf32>
    %14 = vector.broadcast %12 : vector<32x1xf32> to vector<32x128xf32>
    %15 = arith.mulf %14, %13 : vector<32x128xf32>
    %16 = vector.broadcast %11 : vector<32x1xf32> to vector<32x128xf32>
    %17 = arith.addf %16, %15 : vector<32x128xf32>
    %18 = vector.extract_strided_slice %1 {offsets = [0, 1], sizes = [32, 1], strides = [1, 1]} : vector<32x3xf32> to vector<32x1xf32>
    %19 = arith.extf %7 : vector<32x128xbf16> to vector<32x128xf32>
    %20 = vector.broadcast %18 : vector<32x1xf32> to vector<32x128xf32>
    %21 = arith.mulf %20, %19 : vector<32x128xf32>
    %22 = arith.addf %17, %21 : vector<32x128xf32>
    %23 = vector.extract_strided_slice %1 {offsets = [0, 2], sizes = [32, 1], strides = [1, 1]} : vector<32x3xf32> to vector<32x1xf32>
    %24 = arith.extf %10 : vector<32x128xbf16> to vector<32x128xf32>
    %25 = vector.broadcast %23 : vector<32x1xf32> to vector<32x128xf32>
    %26 = arith.mulf %25, %24 : vector<32x128xf32>
    %27 = arith.addf %22, %26 : vector<32x128xf32>
    %28 = arith.truncf %27 : vector<32x128xf32> to vector<32x128xbf16>
    %cst = arith.constant 0.000000e+00 : bf16
    %29 = vector.broadcast %cst : bf16 to vector<32x128xbf16>
    %30 = arith.maximumf %28, %29 : vector<32x128xbf16>
    %c0_5 = arith.constant 0 : index
    %c0_6 = arith.constant 0 : index
    %c0_7 = arith.constant 0 : index
    %31 = vector.load %arg4[%c0_5, %c0_6, %c0_7] : memref<7x32x32xbf16, #tpu.memory_space<vmem>>, vector<1x32x32xbf16>
    %32 = vector.shape_cast %31 : vector<1x32x32xbf16> to vector<32x32xbf16>
    %cst_8 = arith.constant dense<0.000000e+00> : vector<32x128xf32>
    %33 = tpu.matmul %32, %30, %cst_8 {dimension_numbers = #tpu.dot_dimension_numbers<[1], [0], [0], [1], [0, 0, 1, 1], [], []>} : vector<32x32xbf16>, vector<32x128xbf16>, vector<32x128xf32> -> vector<32x128xf32>
    %c0_9 = arith.constant 0 : index
    %c0_10 = arith.constant 0 : index
    %c0_11 = arith.constant 0 : index
    %34 = vector.load %arg5[%c0_9, %c0_10, %c0_11] : memref<7x32x1xf32, #tpu.memory_space<vmem>>, vector<1x32x1xf32>
    %35 = vector.shape_cast %34 : vector<1x32x1xf32> to vector<32x1xf32>
    %36 = vector.broadcast %35 : vector<32x1xf32> to vector<32x128xf32>
    %37 = arith.addf %33, %36 : vector<32x128xf32>
    %38 = arith.truncf %37 : vector<32x128xf32> to vector<32x128xbf16>
    %cst_12 = arith.constant 0.000000e+00 : bf16
    %39 = vector.broadcast %cst_12 : bf16 to vector<32x128xbf16>
    %40 = arith.maximumf %38, %39 : vector<32x128xbf16>
    %c1 = arith.constant 1 : index
    %c0_13 = arith.constant 0 : index
    %c0_14 = arith.constant 0 : index
    %41 = vector.load %arg4[%c1, %c0_13, %c0_14] : memref<7x32x32xbf16, #tpu.memory_space<vmem>>, vector<1x32x32xbf16>
    %42 = vector.shape_cast %41 : vector<1x32x32xbf16> to vector<32x32xbf16>
    %cst_15 = arith.constant dense<0.000000e+00> : vector<32x128xf32>
    %43 = tpu.matmul %42, %40, %cst_15 {dimension_numbers = #tpu.dot_dimension_numbers<[1], [0], [0], [1], [0, 0, 1, 1], [], []>} : vector<32x32xbf16>, vector<32x128xbf16>, vector<32x128xf32> -> vector<32x128xf32>
    %c1_16 = arith.constant 1 : index
    %c0_17 = arith.constant 0 : index
    %c0_18 = arith.constant 0 : index
    %44 = vector.load %arg5[%c1_16, %c0_17, %c0_18] : memref<7x32x1xf32, #tpu.memory_space<vmem>>, vector<1x32x1xf32>
    %45 = vector.shape_cast %44 : vector<1x32x1xf32> to vector<32x1xf32>
    %46 = vector.broadcast %45 : vector<32x1xf32> to vector<32x128xf32>
    %47 = arith.addf %43, %46 : vector<32x128xf32>
    %48 = arith.truncf %47 : vector<32x128xf32> to vector<32x128xbf16>
    %cst_19 = arith.constant 0.000000e+00 : bf16
    %49 = vector.broadcast %cst_19 : bf16 to vector<32x128xbf16>
    %50 = arith.maximumf %48, %49 : vector<32x128xbf16>
    %c2 = arith.constant 2 : index
    %c0_20 = arith.constant 0 : index
    %c0_21 = arith.constant 0 : index
    %51 = vector.load %arg4[%c2, %c0_20, %c0_21] : memref<7x32x32xbf16, #tpu.memory_space<vmem>>, vector<1x32x32xbf16>
    %52 = vector.shape_cast %51 : vector<1x32x32xbf16> to vector<32x32xbf16>
    %cst_22 = arith.constant dense<0.000000e+00> : vector<32x128xf32>
    %53 = tpu.matmul %52, %50, %cst_22 {dimension_numbers = #tpu.dot_dimension_numbers<[1], [0], [0], [1], [0, 0, 1, 1], [], []>} : vector<32x32xbf16>, vector<32x128xbf16>, vector<32x128xf32> -> vector<32x128xf32>
    %c2_23 = arith.constant 2 : index
    %c0_24 = arith.constant 0 : index
    %c0_25 = arith.constant 0 : index
    %54 = vector.load %arg5[%c2_23, %c0_24, %c0_25] : memref<7x32x1xf32, #tpu.memory_space<vmem>>, vector<1x32x1xf32>
    %55 = vector.shape_cast %54 : vector<1x32x1xf32> to vector<32x1xf32>
    %56 = vector.broadcast %55 : vector<32x1xf32> to vector<32x128xf32>
    %57 = arith.addf %53, %56 : vector<32x128xf32>
    %58 = arith.truncf %57 : vector<32x128xf32> to vector<32x128xbf16>
    %cst_26 = arith.constant 0.000000e+00 : bf16
    %59 = vector.broadcast %cst_26 : bf16 to vector<32x128xbf16>
    %60 = arith.maximumf %58, %59 : vector<32x128xbf16>
    %c3 = arith.constant 3 : index
    %c0_27 = arith.constant 0 : index
    %c0_28 = arith.constant 0 : index
    %61 = vector.load %arg4[%c3, %c0_27, %c0_28] : memref<7x32x32xbf16, #tpu.memory_space<vmem>>, vector<1x32x32xbf16>
    %62 = vector.shape_cast %61 : vector<1x32x32xbf16> to vector<32x32xbf16>
    %cst_29 = arith.constant dense<0.000000e+00> : vector<32x128xf32>
    %63 = tpu.matmul %62, %60, %cst_29 {dimension_numbers = #tpu.dot_dimension_numbers<[1], [0], [0], [1], [0, 0, 1, 1], [], []>} : vector<32x32xbf16>, vector<32x128xbf16>, vector<32x128xf32> -> vector<32x128xf32>
    %c3_30 = arith.constant 3 : index
    %c0_31 = arith.constant 0 : index
    %c0_32 = arith.constant 0 : index
    %64 = vector.load %arg5[%c3_30, %c0_31, %c0_32] : memref<7x32x1xf32, #tpu.memory_space<vmem>>, vector<1x32x1xf32>
    %65 = vector.shape_cast %64 : vector<1x32x1xf32> to vector<32x1xf32>
    %66 = vector.broadcast %65 : vector<32x1xf32> to vector<32x128xf32>
    %67 = arith.addf %63, %66 : vector<32x128xf32>
    %68 = arith.truncf %67 : vector<32x128xf32> to vector<32x128xbf16>
    %cst_33 = arith.constant 0.000000e+00 : bf16
    %69 = vector.broadcast %cst_33 : bf16 to vector<32x128xbf16>
    %70 = arith.maximumf %68, %69 : vector<32x128xbf16>
    %c4 = arith.constant 4 : index
    %c0_34 = arith.constant 0 : index
    %c0_35 = arith.constant 0 : index
    %71 = vector.load %arg4[%c4, %c0_34, %c0_35] : memref<7x32x32xbf16, #tpu.memory_space<vmem>>, vector<1x32x32xbf16>
    %72 = vector.shape_cast %71 : vector<1x32x32xbf16> to vector<32x32xbf16>
    %cst_36 = arith.constant dense<0.000000e+00> : vector<32x128xf32>
    %73 = tpu.matmul %72, %70, %cst_36 {dimension_numbers = #tpu.dot_dimension_numbers<[1], [0], [0], [1], [0, 0, 1, 1], [], []>} : vector<32x32xbf16>, vector<32x128xbf16>, vector<32x128xf32> -> vector<32x128xf32>
    %c4_37 = arith.constant 4 : index
    %c0_38 = arith.constant 0 : index
    %c0_39 = arith.constant 0 : index
    %74 = vector.load %arg5[%c4_37, %c0_38, %c0_39] : memref<7x32x1xf32, #tpu.memory_space<vmem>>, vector<1x32x1xf32>
    %75 = vector.shape_cast %74 : vector<1x32x1xf32> to vector<32x1xf32>
    %76 = vector.broadcast %75 : vector<32x1xf32> to vector<32x128xf32>
    %77 = arith.addf %73, %76 : vector<32x128xf32>
    %78 = arith.truncf %77 : vector<32x128xf32> to vector<32x128xbf16>
    %cst_40 = arith.constant 0.000000e+00 : bf16
    %79 = vector.broadcast %cst_40 : bf16 to vector<32x128xbf16>
    %80 = arith.maximumf %78, %79 : vector<32x128xbf16>
    %c5 = arith.constant 5 : index
    %c0_41 = arith.constant 0 : index
    %c0_42 = arith.constant 0 : index
    %81 = vector.load %arg4[%c5, %c0_41, %c0_42] : memref<7x32x32xbf16, #tpu.memory_space<vmem>>, vector<1x32x32xbf16>
    %82 = vector.shape_cast %81 : vector<1x32x32xbf16> to vector<32x32xbf16>
    %cst_43 = arith.constant dense<0.000000e+00> : vector<32x128xf32>
    %83 = tpu.matmul %82, %80, %cst_43 {dimension_numbers = #tpu.dot_dimension_numbers<[1], [0], [0], [1], [0, 0, 1, 1], [], []>} : vector<32x32xbf16>, vector<32x128xbf16>, vector<32x128xf32> -> vector<32x128xf32>
    %c5_44 = arith.constant 5 : index
    %c0_45 = arith.constant 0 : index
    %c0_46 = arith.constant 0 : index
    %84 = vector.load %arg5[%c5_44, %c0_45, %c0_46] : memref<7x32x1xf32, #tpu.memory_space<vmem>>, vector<1x32x1xf32>
    %85 = vector.shape_cast %84 : vector<1x32x1xf32> to vector<32x1xf32>
    %86 = vector.broadcast %85 : vector<32x1xf32> to vector<32x128xf32>
    %87 = arith.addf %83, %86 : vector<32x128xf32>
    %88 = arith.truncf %87 : vector<32x128xf32> to vector<32x128xbf16>
    %cst_47 = arith.constant 0.000000e+00 : bf16
    %89 = vector.broadcast %cst_47 : bf16 to vector<32x128xbf16>
    %90 = arith.maximumf %88, %89 : vector<32x128xbf16>
    %c6 = arith.constant 6 : index
    %c0_48 = arith.constant 0 : index
    %c0_49 = arith.constant 0 : index
    %91 = vector.load %arg4[%c6, %c0_48, %c0_49] : memref<7x32x32xbf16, #tpu.memory_space<vmem>>, vector<1x32x32xbf16>
    %92 = vector.shape_cast %91 : vector<1x32x32xbf16> to vector<32x32xbf16>
    %cst_50 = arith.constant dense<0.000000e+00> : vector<32x128xf32>
    %93 = tpu.matmul %92, %90, %cst_50 {dimension_numbers = #tpu.dot_dimension_numbers<[1], [0], [0], [1], [0, 0, 1, 1], [], []>} : vector<32x32xbf16>, vector<32x128xbf16>, vector<32x128xf32> -> vector<32x128xf32>
    %c6_51 = arith.constant 6 : index
    %c0_52 = arith.constant 0 : index
    %c0_53 = arith.constant 0 : index
    %94 = vector.load %arg5[%c6_51, %c0_52, %c0_53] : memref<7x32x1xf32, #tpu.memory_space<vmem>>, vector<1x32x1xf32>
    %95 = vector.shape_cast %94 : vector<1x32x1xf32> to vector<32x1xf32>
    %96 = vector.broadcast %95 : vector<32x1xf32> to vector<32x128xf32>
    %97 = arith.addf %93, %96 : vector<32x128xf32>
    %cst_54 = arith.constant 0.000000e+00 : f32
    %98 = vector.broadcast %cst_54 : f32 to vector<32x128xf32>
    %99 = arith.maximumf %97, %98 : vector<32x128xf32>
    %c0_55 = arith.constant 0 : index
    %c0_56 = arith.constant 0 : index
    %100 = vector.load %arg6[%c0_55, %c0_56] : memref<32x1xf32, #tpu.memory_space<vmem>>, vector<32x1xf32>
    %101 = vector.broadcast %100 : vector<32x1xf32> to vector<32x128xf32>
    %102 = arith.mulf %101, %99 : vector<32x128xf32>
    %cst_57 = arith.constant dense<0.000000e+00> : vector<128xf32>
    %103 = vector.multi_reduction <add>, %102, %cst_57 [0] : vector<32x128xf32> to vector<128xf32>
    %104 = vector.shape_cast %103 : vector<128xf32> to vector<1x128xf32>
    %c0_58 = arith.constant 0 : index
    %c0_59 = arith.constant 0 : index
    %105 = vector.load %arg7[%c0_58, %c0_59] : memref<1x1xf32, #tpu.memory_space<vmem>>, vector<1x1xf32>
    %106 = vector.broadcast %105 : vector<1x1xf32> to vector<1x128xf32>
    %107 = arith.addf %104, %106 : vector<1x128xf32>
    %108 = arith.negf %107 : vector<1x128xf32>
    %109 = math.exp %108 : vector<1x128xf32>
    %cst_60 = arith.constant 1.000000e+00 : f32
    %110 = vector.broadcast %cst_60 : f32 to vector<1x128xf32>
    %111 = arith.addf %110, %109 : vector<1x128xf32>
    %112 = arith.divf %110, %111 : vector<1x128xf32>
    %c0_61 = arith.constant 0 : index
    %c0_62 = arith.constant 0 : index
    %113 = vector.load %arg8[%c0_61, %c0_62] : memref<1x128xf32, #tpu.memory_space<vmem>>, vector<1x128xf32>
    tpu.vector_store %arg8[%c0_61, %c0_62], %112 {strides = array<i32>} : memref<1x128xf32, #tpu.memory_space<vmem>>, vector<1x128xf32>,
    return
  }
  func.func @transform_0(%arg0: i32) -> (i32, i32) {
    %c0_i32 = arith.constant 0 : i32
    %c0_i32_0 = arith.constant 0 : i32
    return %c0_i32, %arg0 : i32, i32
  }
  func.func @transform_1(%arg0: i32) -> (i32, i32) {
    %c0_i32 = arith.constant 0 : i32
    %c0_i32_0 = arith.constant 0 : i32
    %c0_i32_1 = arith.constant 0 : i32
    return %c0_i32, %c0_i32_0 : i32, i32
  }
  func.func @transform_2(%arg0: i32) -> (i32, i32) {
    %c0_i32 = arith.constant 0 : i32
    %c0_i32_0 = arith.constant 0 : i32
    %c0_i32_1 = arith.constant 0 : i32
    return %c0_i32, %c0_i32_0 : i32, i32
  }
  func.func @transform_3(%arg0: i32) -> (i32, i32, i32) {
    %c0_i32 = arith.constant 0 : i32
    %c0_i32_0 = arith.constant 0 : i32
    %c0_i32_1 = arith.constant 0 : i32
    %c0_i32_2 = arith.constant 0 : i32
    return %c0_i32, %c0_i32_0, %c0_i32_1 : i32, i32, i32
  }
  func.func @transform_4(%arg0: i32) -> (i32, i32, i32) {
    %c0_i32 = arith.constant 0 : i32
    %c0_i32_0 = arith.constant 0 : i32
    %c0_i32_1 = arith.constant 0 : i32
    %c0_i32_2 = arith.constant 0 : i32
    return %c0_i32, %c0_i32_0, %c0_i32_1 : i32, i32, i32
  }
  func.func @transform_5(%arg0: i32) -> (i32, i32) {
    %c0_i32 = arith.constant 0 : i32
    %c0_i32_0 = arith.constant 0 : i32
    %c0_i32_1 = arith.constant 0 : i32
    return %c0_i32, %c0_i32_0 : i32, i32
  }
  func.func @transform_6(%arg0: i32) -> (i32, i32) {
    %c0_i32 = arith.constant 0 : i32
    %c0_i32_0 = arith.constant 0 : i32
    %c0_i32_1 = arith.constant 0 : i32
    return %c0_i32, %c0_i32_0 : i32, i32
  }
  func.func @transform_7(%arg0: i32) -> (i32, i32) {
    %c0_i32 = arith.constant 0 : i32
    %c0_i32_0 = arith.constant 0 : i32
    return %c0_i32, %arg0 : i32, i32
  }
}

</mosaic_0001>

<bundles_post_ra>
// kernel: mlp_forward.1
= control target key start
LH: loop header
LB: loop body
LE: loop exit
PB: predicated region body
PF: predicated region fallthrough
CT: control target
= control target key end

     0   :  { %s1284_s26 = smov 0   ;;  %s1485_s0 = inlined_call_operand.vmem [shape: bf16[3,256], index: 0, kind: input, shape index: {}]   ;;  %s1486_s1 = inlined_call_operand.vmem [shape: f32[32,3], index: 1, kind: input, shape index: {}]   ;;  %s1487_s2 = inlined_call_operand.vmem [shape: f32[32,1], index: 2, kind: input, shape index: {}]   ;;  %s1488_s3 = inlined_call_operand.vmem [shape: bf16[7,32,32], index: 3, kind: input, shape index: {}]   ;;  %s1489_s4 = inlined_call_operand.vmem [shape: f32[7,32,1], index: 4, kind: input, shape index: {}]   ;;  %s1490_s5 = inlined_call_operand.vmem [shape: f32[32,1], index: 5, kind: input, shape index: {}]   ;;  %s1491_s6 = inlined_call_operand.<no memory space> [shape: f32[1,1], index: 6, kind: input, shape index: {}]   ;;  %s1492_s7 = inlined_call_operand.vmem [shape: f32[1,256], index: 7, kind: output, shape index: {}]  }
   0x1   :  { %v12_v0 = vstv %s1491_s6 }
   0x2   :  { %13 = vst [vmem:[#allocation2] sm:$0x1] %v12_v0 }
   0x3 LB: > { %s1060_s27 = sadd.s32 4294967295, %s1236_s26   ;;  %p1064_p0 = scmp.ge.s32.totalorder %s1236_s26, 1  ;;  %s1236_s26 = sphi %s1284_s26, %s19_s26  }
   0x4   : > { %p238_p1 = scmp.lt.s32.totalorder %s1236_s26, 3 }
   0x6   : > { %p239_p2 = pnand %p1064_p0, %p238_p1 }
   0x7   : > { %p267_p3 = scmp.lt.s32.totalorder (!%p239_p2), %s1060_s27, 1 }
   0x8   : > { %242 = sbr.rel (%p239_p2) target bundleno = 1370 (0x55a), region = 48 }
   0xd   : > { %v291_v1 = vld [vmem:[%s1487_s2 + $0x10] sm:$0xff]  ;;  %v1238_v3 = vmov 0   ;;  %v1239_v4 = vmov 1   ;;  %v292_v5 = vld [vmem:[%s1487_s2 + $0x18] sm:$0xff]  ;;  %v277_v7 = vld [vmem:[%s1486_s1 + $0x8] sm:$0xff]  ;;  %v1240_v9 = vmov 2  }
   0xe   : > { %v278_v2 = vld [vmem:[%s1486_s1 + $0x10] sm:$0xff]  ;;  %1215 = vset.pattern.permute.xlu1 %v1238_v3  ;;  %1214 = vset.pattern.permute.xlu0 %v1238_v3  ;;  %v279_v6 = vld [vmem:[%s1486_s1 + $0x18] sm:$0xff]  ;;  %v276_v8 = vld [vmem:[%s1486_s1] sm:$0xff]  ;;  %s1494_s27 = smov (!%p267_p3, %s1060_s27), 1  ;;  %vm444_vm0 = vcmask 261120  }
   0xf   : > { %330 = vperm.xlu1 %1215, %v291_v1   ;;  %306 = vperm.xlu0 %1214, %v278_v2   ;;  %v289_v10 = vld [vmem:[%s1487_s2] sm:$0xff]  ;;  %v290_v11 = vld [vmem:[%s1487_s2 + $0x8] sm:$0xff]  ;;  %v413_v13 = vld [vmem:[%s1489_s4 + $0x18] sm:$0xff]  ;;  %s1065_s14 = sshll.u32 %s1494_s27, 1  ;;  %s273_s8 = scalar_lea.vmem %s1492_s7, %s1494_s27 }
  0x10   : > { %1216 = vset.pattern.permute.xlu2 %v1239_v4  ;;  %v410_v12 = vld [vmem:[%s1489_s4] sm:$0xff]  ;;  %v412_v14 = vld [vmem:[%s1489_s4 + $0x10] sm:$0xff]  ;;  %v411_v17 = vld [vmem:[%s1489_s4 + $0x8] sm:$0xff]  ;;  %s270_s21 = scalar_lea.vmem %s1485_s0, %s1065_s14 }
  0x11   : > { %352 = vperm.xlu2 %1216, %v278_v2   ;;  %v1082_v15 = vld [vmem:[%s1489_s4 + $0x30] sm:$0xff]  ;;  %v1080_v16 = vld [vmem:[%s1489_s4 + $0x20] sm:$0xff]  ;;  %v1081_v18 = vld [vmem:[%s1489_s4 + $0x28] sm:$0xff] }
  0x12   : > { %v1101_v19 = vld [vmem:[%s1489_s4 + $0x58] sm:$0xff]  ;;  %v1098_v21 = vld [vmem:[%s1489_s4 + $0x40] sm:$0xff]  ;;  %v1118_v23 = vld [vmem:[%s1489_s4 + $0x70] sm:$0xff] }
  0x13   : > { %v1083_v20 = vld [vmem:[%s1489_s4 + $0x38] sm:$0xff]  ;;  %v275_v24 = vld [vmem:[%s270_s21] sm:$0x3]  ;;  %v1100_v29 = vld [vmem:[%s1489_s4 + $0x50] sm:$0xff] }
  0x14   : > { %v284_v27 = vshrl.u32 %v275_v24, 16  ;;  %v281_v28 = vpack.i.b16 %v275_v24, %v275_v24  ;;  %v1119_v30 = vld [vmem:[%s1489_s4 + $0x78] sm:$0xff]  ;;  %v1117_v34 = vld [vmem:[%s1489_s4 + $0x68] sm:$0xff]  ;;  %v1136_v40 = vld [vmem:[%s1489_s4 + $0x90] sm:$0xff] }
  0x15   : > { %v1099_v39 = vld [vmem:[%s1489_s4 + $0x48] sm:$0xff]  ;;  %v1134_v44 = vld [vmem:[%s1489_s4 + $0x80] sm:$0xff]  ;;  %v1155_v57 = vld [vmem:[%s1489_s4 + $0xb8] sm:$0xff] }
  0x16   : > { %v285_v32 = vpack.i.b16 %v284_v27, %v284_v27  ;;  %v283_v33 = vperm.slane %v281_v28, 0  ;;  %v288_v43 = vperm.slane %v281_v28, 1  ;;  %v1116_v48 = vld [vmem:[%s1489_s4 + $0x60] sm:$0xff]  ;;  %v1135_v49 = vld [vmem:[%s1489_s4 + $0x88] sm:$0xff]  ;;  %v1137_v60 = vld [vmem:[%s1489_s4 + $0x98] sm:$0xff] }
  0x17   : > { %335 = vperm.xlu1 %1215, %v292_v5   ;;  %311 = vperm.xlu0 %1214, %v279_v6   ;;  %v1152_v61 = vld [vmem:[%s1489_s4 + $0xa0] sm:$0xff]  ;;  %v950_v28 = vld [vmem:[%s1490_s5 + $0x10] sm:$0xff] }
  0x18   : > { %v287_v37 = vperm.slane %v285_v32, 0  ;;  %v293_v38 = vunpack.c.l.bf16 %v283_v33  ;;  %v367_v52 = vunpack.c.l.bf16 %v288_v43  ;;  %v1172_v33 = vld [vmem:[%s1489_s4 + $0xd0] sm:$0xff] }
  0x19   : > { %356 = vperm.xlu2 %1216, %v279_v6  }
  0x1a   : > { %v342_v41 = vunpack.c.l.bf16 %v287_v37  ;;  %v949_v37 = vld [vmem:[%s1490_s5 + $0x8] sm:$0xff] }
  0x1f   : > { %301 = vperm.xlu1 %1215, %v277_v7   ;;  %296 = vperm.xlu0 %1214, %v276_v8  }
  0x21   : > { %1217 = vset.pattern.permute.xlu2 %v1240_v9 }
  0x22   : > { %377 = vperm.xlu2 %1217, %v278_v2  }
  0x27   : > { %320 = vperm.xlu1 %1215, %v289_v10   ;;  %1218 = vset.pattern.permute.xlu0 %v1240_v9 }
  0x28   : > { %381 = vperm.xlu0 %1218, %v279_v6  }
  0x2a   : > { %1219 = vset.pattern.permute.xlu2 %v1238_v3 }
  0x2b   : > { %325 = vperm.xlu2 %1219, %v290_v11  }
  0x2f   : > { %1220 = vset.pattern.permute.xlu1 %v1239_v4 }
  0x30   : > { %344 = vperm.xlu1 %1220, %v276_v8   ;;  %369 = vperm.xlu0 %1218, %v276_v8   ;;  %v1154_v8 = vld [vmem:[%s1489_s4 + $0xb0] sm:$0xff] }
  0x33   : > { %1221 = vset.pattern.permute.xlu2 %v1239_v4  ;;  %v1170_v4 = vld [vmem:[%s1489_s4 + $0xc0] sm:$0xff] }
  0x34   : > { %348 = vperm.xlu2 %1221, %v277_v7  }
  0x38   : > { %1222 = vset.pattern.permute.xlu1 %v1240_v9  ;;  %1224 = vset.pattern.permute.xlu0 %v1238_v3  ;;  %v1171_v9 = vld [vmem:[%s1489_s4 + $0xc8] sm:$0xff] }
  0x39   : > { %373 = vperm.xlu1 %1222, %v277_v7   ;;  %431 = vperm.xlu0 %1224, %v413_v13  }
  0x3c   : > { %1223 = vset.pattern.permute.xlu2 %v1238_v3 }
  0x3d   : > { %426 = vperm.xlu2 %1223, %v412_v14  }
  0x41   : > { %1225 = vset.pattern.permute.xlu1 %v1238_v3  ;;  %496 = vperm.xlu0 %1224, %v1080_v16   ;;  %v1173_v16 = vld [vmem:[%s1489_s4 + $0xd8] sm:$0xff] }
  0x42   : > { %416 = vperm.xlu1 %1225, %v410_v12  }
  0x45   : > { %421 = vperm.xlu2 %1223, %v411_v17  }
  0x49   : > { %590 = vperm.xlu0 %1224, %v1101_v19  }
  0x4a   : > { %506 = vperm.xlu1 %1225, %v1082_v15  }
  0x4d   : > { %511 = vperm.xlu2 %1223, %v1083_v20  }
  0x51   : > { %664 = vperm.xlu0 %1224, %v1118_v23   ;;  %v948_v23 = vld [vmem:[%s1490_s5] sm:$0xff] }
  0x52   : > { %501 = vperm.xlu1 %1225, %v1081_v18  }
  0x55   : > { %585 = vperm.xlu2 %1223, %v1100_v29  }
  0x59   : > { %659 = vperm.xlu0 %1224, %v1117_v34   ;;  %v951_v34 = vld [vmem:[%s1490_s5 + $0x18] sm:$0xff] }
  0x5a   : > { %575 = vperm.xlu1 %1225, %v1098_v21  }
  0x5d   : > { %580 = vperm.xlu2 %1223, %v1099_v39  }
  0x61   : > { %733 = vperm.xlu0 %1224, %v1134_v44  }
  0x62   : > { %669 = vperm.xlu1 %1225, %v1119_v30  }
  0x65   : > { %654 = vperm.xlu2 %1223, %v1116_v48  }
  0x69   : > { %827 = vperm.xlu0 %1224, %v1155_v57   ;;  %v1189_v57 = vld [vmem:[%s1488_s3 + $0x10] sm:$0xff] }
  0x6a   : > { %743 = vperm.xlu1 %1225, %v1136_v40  }
  0x6b   : > { %v353_v22 = vpop.permute.xlu2 %352 }
  0x6c   : > { %v361_v50 = vmul.f32 %v353_v22, %v342_v41  ;;  %v1153_v22 = vld [vmem:[%s1489_s4 + $0xa8] sm:$0xff] }
  0x6d   : > { %748 = vperm.xlu2 %1223, %v1137_v60  }
  0x71   : > { %891 = vperm.xlu0 %1224, %v1170_v4  }
  0x72   : > { %738 = vperm.xlu1 %1225, %v1135_v49  }
  0x73   : > { %v357_v31 = vpop.permute.xlu2 %356 }
  0x74   : > { %v362_v58 = vmul.f32 %v357_v31, %v342_v41 }
  0x75   : > { %822 = vperm.xlu2 %1223, %v1154_v8  }
  0x79   : > { %906 = vperm.xlu0 %1224, %v1173_v16  }
  0x7a   : > { %812 = vperm.xlu1 %1225, %v1152_v61  }
  0x7c   : > { %v378_v45 = vpop.permute.xlu2 %377 }
  0x7d   : > { %v386_v55 = vmul.f32 %v378_v45, %v367_v52  ;;  %817 = vperm.xlu2 %1223, %v1153_v22  }
  0x81   : > { %v331_v25 = vpop.permute.xlu1 %330  ;;  %v307_v26 = vpop.permute.xlu0 %306  ;;  %964 = vperm.xlu0 %1224, %v950_v28  }
  0x82   : > { %v316_v42 = vmul.f32 %v307_v26, %v293_v38  ;;  %896 = vperm.xlu1 %1225, %v1171_v9  }
  0x84   : > { %v340_v51 = vadd.f32 %v331_v25, %v316_v42 }
  0x85   : > { %v326_v0 = vpop.permute.xlu2 %325  ;;  %901 = vperm.xlu2 %1223, %v1172_v33   ;;  %v1193_v33 = vld [vmem:[%s1488_s3 + $0x30] sm:$0xff] }
  0x86   : > { %v365_v54 = vadd.f32 %v361_v50, %v340_v51 }
  0x88   : > { %v390_v63 = vadd.f32 %v386_v55, %v365_v54 }
  0x89   : > { %v336_v35 = vpop.permute.xlu1 %335  ;;  %v312_v36 = vpop.permute.xlu0 %311 }
  0x8a   : > { %v317_v53 = vmul.f32 %v312_v36, %v293_v38  ;;  %v402_v5 = vmax.f32 %v390_v63, 0.0  ;;  %954 = vperm.xlu1 %1225, %v948_v23   ;;  %v1187_v36 = vld [vmem:[%s1488_s3] sm:$0xff] }
  0x8c   : > { %v341_v56 = vadd.f32 %v336_v35, %v317_v53  ;;  %v1188_v35 = vld [vmem:[%s1488_s3 + $0x8] sm:$0xff] }
  0x8d   : > { %959 = vperm.xlu2 %1223, %v949_v37  }
  0x8e   : > { %v366_v1 = vadd.f32 %v362_v58, %v341_v56  ;;  %v349_v14 = vpop.permute.xlu2 %348  ;;  %v1190_v58 = vld [vmem:[%s1488_s3 + $0x18] sm:$0xff] }
  0x8f   : > { %v360_v19 = vmul.f32 %v349_v14, %v342_v41  ;;  %v1192_v14 = vld [vmem:[%s1488_s3 + $0x28] sm:$0xff] }
  0x91   : > { %v302_v46 = vpop.permute.xlu1 %301  ;;  %v297_v47 = vpop.permute.xlu0 %296 }
  0x92   : > { %v315_v11 = vmul.f32 %v302_v46, %v293_v38  ;;  %v314_v12 = vmul.f32 %v297_v47, %v293_v38  ;;  %969 = vperm.xlu1 %1225, %v951_v34   ;;  %v985_v38 = vld [vmem:[#allocation2] sm:$0x1]  ;;  %v1194_v34 = vld [vmem:[%s1488_s3 + $0x38] sm:$0xff] }
  0x94   : > { %v339_v18 = vadd.f32 %v326_v0, %v315_v11 }
  0x95   : > { %988 = vperm.xlu2 %1223, %v985_v38  }
  0x96   : > { %v364_v25 = vadd.f32 %v360_v19, %v339_v18 }
  0x97   : > { %v427_v40 = vpop.permute.xlu2 %426 }
  0x99   : > { %v321_v59 = vpop.permute.xlu1 %320 }
  0x9a   : > { %v382_v62 = vpop.permute.xlu0 %381  ;;  %v338_v17 = vadd.f32 %v321_v59, %v314_v12 }
  0x9b   : > { %v387_v2 = vmul.f32 %v382_v62, %v367_v52 }
  0x9d   : > { %v391_v3 = vadd.f32 %v387_v2, %v366_v1 }
  0x9f   : > { %v403_v6 = vmax.f32 %v391_v3, 0.0  ;;  %v422_v43 = vpop.permute.xlu2 %421 }
  0xa1   : > { %v405_v7 = vpack.c.bf16 %v403_v6, %v402_v5 }
  0xa2   : > { %v345_v10 = vpop.permute.xlu1 %344  ;;  %v370_v15 = vpop.permute.xlu0 %369 }
  0xa3   : > { %457 = vmatpush.bf16.msra.mxu0 %v405_v7  ;;  %1201 = vmatpush.bf16.msra.mxu3 %v405_v7  ;;  %v359_v13 = vmul.f32 %v345_v10, %v342_v41  ;;  %v384_v21 = vmul.f32 %v370_v15, %v367_v52 }
  0xa5   : > { %v363_v20 = vadd.f32 %v359_v13, %v338_v17  ;;  %v1191_v13 = vld [vmem:[%s1488_s3 + $0x20] sm:$0xff] }
  0xa7   : > { %v388_v26 = vadd.f32 %v384_v21, %v363_v20  ;;  %v512_v63 = vpop.permute.xlu2 %511 }
  0xa9   : > { %v400_v30 = vmax.f32 %v388_v26, 0.0 }
  0xab   : > { %v374_v24 = vpop.permute.xlu1 %373  ;;  %v432_v46 = vpop.permute.xlu0 %431 }
  0xac   : > { %v385_v27 = vmul.f32 %v374_v24, %v367_v52 }
  0xae   : > { %v389_v29 = vadd.f32 %v385_v27, %v364_v25 }
  0xaf   : > { %v586_v17 = vpop.permute.xlu2 %585 }
  0xb0   : > { %v401_v31 = vmax.f32 %v389_v29, 0.0 }
  0xb2   : > { %v404_v32 = vpack.c.bf16 %v401_v31, %v400_v30 }
  0xb3   : > { %v497_v5 = vpop.permute.xlu0 %496 }
  0xb4   : > { %458 = vmatpush.bf16.msra.mxu0 %v404_v32  ;;  %1202 = vmatpush.bf16.msra.mxu3 %v404_v32  ;;  %v417_v44 = vpop.permute.xlu1 %416 }
  0xb7   : > { %1075 = vmatmul.msk.bf16.vlgmr.msra.gmra.mxu3 %vm444_vm0, %v1188_v35  ;;  %1074 = vmatmul.msk.bf16.vlgmr.msra.gmra.mxu0 %vm444_vm0, %v1187_v36  ;;  %v581_v19 = vpop.permute.xlu2 %580 }
  0xbb   : > { %v591_v21 = vpop.permute.xlu0 %590 }
  0xbc   : > { %v507_v61 = vpop.permute.xlu1 %506 }
  0xc3   : > { %v665_v37 = vpop.permute.xlu0 %664 }
  0xc4   : > { %v502_v1 = vpop.permute.xlu1 %501 }
  0xcc   : > { %v576_v25 = vpop.permute.xlu1 %575 }
 0x134   : > { %v460_v39 = vpop.f32.mrf.mxu0 }
 0x135   : > { %v461_v48 = vadd.f32 %v460_v39, %v417_v44  ;;  %v670_v39 = vpop.permute.xlu1 %669 }
 0x137   : > { %v478_v53 = vmax.f32 %v461_v48, 0.0 }
 0x13a   : > { %v465_v41 = vpop.f32.mrf.mxu3 }
 0x13b   : > { %v466_v45 = vadd.f32 %v465_v41, %v427_v40  ;;  %v660_v41 = vpop.permute.xlu0 %659 }
 0x13c   : > { %v462_v42 = vpop.f32.mrf.mxu0 }
 0x13d   : > { %v463_v49 = vadd.f32 %v462_v42, %v422_v43  ;;  %v480_v51 = vmax.f32 %v466_v45, 0.0  ;;  %v655_v45 = vpop.permute.xlu2 %654 }
 0x13f   : > { %v479_v54 = vmax.f32 %v463_v49, 0.0 }
 0x141   : > { %v482_v56 = vpack.c.bf16 %v479_v54, %v478_v53  ;;  %v1195_v53 = vld [vmem:[%s1488_s3 + $0x40] sm:$0xff]  ;;  %v1196_v54 = vld [vmem:[%s1488_s3 + $0x48] sm:$0xff] }
 0x142   : > { %v467_v47 = vpop.f32.mrf.mxu3 }
 0x143   : > { %v468_v50 = vadd.f32 %v467_v47, %v432_v46 }
 0x145   : > { %v481_v52 = vmax.f32 %v468_v50, 0.0 }
 0x147   : > { %v483_v55 = vpack.c.bf16 %v481_v52, %v480_v51 }
 0x149   : > { %536 = vmatpush.bf16.msra.mxu1 %v483_v55 }
 0x14d   : > { %537 = vmatpush.bf16.msra.mxu1 %v482_v56 }
 0x150   : > { %1092 = vmatmul.msk.bf16.vlgmr.msra.gmra.mxu1 %vm444_vm0, %v1189_v57  ;;  %v744_v57 = vpop.permute.xlu1 %743 }
 0x160   : > { %1093 = vmatmul.msk.bf16.gmra.mxu1 %vm444_vm0, %v1190_v58 }
 0x1cd   : > { %v539_v59 = vpop.f32.mrf.mxu1 }
 0x1ce   : > { %v540_v6 = vadd.f32 %v539_v59, %v497_v5  ;;  %v749_v59 = vpop.permute.xlu2 %748 }
 0x1d0   : > { %v557_v11 = vmax.f32 %v540_v6, 0.0 }
 0x1d5   : > { %v541_v60 = vpop.f32.mrf.mxu1 }
 0x1d6   : > { %v542_v3 = vadd.f32 %v541_v60, %v502_v1  ;;  %v734_v1 = vpop.permute.xlu0 %733 }
 0x1d8   : > { %v558_v9 = vmax.f32 %v542_v3, 0.0 }
 0x1da   : > { %v561_v12 = vpack.c.bf16 %v558_v9, %v557_v11  ;;  %v1197_v9 = vld [vmem:[%s1488_s3 + $0x50] sm:$0xff] }
 0x1dd   : > { %v544_v62 = vpop.f32.mrf.mxu1 }
 0x1de   : > { %v545_v0 = vadd.f32 %v544_v62, %v507_v61  ;;  %v739_v61 = vpop.permute.xlu1 %738 }
 0x1e0   : > { %v559_v7 = vmax.f32 %v545_v0, 0.0 }
 0x1e5   : > { %v546_v2 = vpop.f32.mrf.mxu1 }
 0x1e6   : > { %v547_v4 = vadd.f32 %v546_v2, %v512_v63 }
 0x1e8   : > { %v560_v8 = vmax.f32 %v547_v4, 0.0 }
 0x1ea   : > { %v562_v10 = vpack.c.bf16 %v560_v8, %v559_v7 }
 0x1ec   : > { %615 = vmatpush.bf16.msra.mxu2 %v562_v10  ;;  %v1198_v10 = vld [vmem:[%s1488_s3 + $0x58] sm:$0xff] }
 0x1f0   : > { %616 = vmatpush.bf16.msra.mxu2 %v561_v12 }
 0x1f3   : > { %1110 = vmatmul.msk.bf16.vlgmr.msra.gmra.mxu2 %vm444_vm0, %v1191_v13  ;;  %v823_v13 = vpop.permute.xlu2 %822 }
 0x203   : > { %1111 = vmatmul.msk.bf16.gmra.mxu2 %vm444_vm0, %v1192_v14 }
 0x276   : > { %v618_v15 = vpop.f32.mrf.mxu2 }
 0x277   : > { %v619_v26 = vadd.f32 %v618_v15, %v576_v25  ;;  %v818_v15 = vpop.permute.xlu2 %817 }
 0x279   : > { %v636_v31 = vmax.f32 %v619_v26, 0.0 }
 0x27e   : > { %v620_v16 = vpop.f32.mrf.mxu2 }
 0x27f   : > { %v621_v23 = vadd.f32 %v620_v16, %v581_v19 }
 0x281   : > { %v637_v29 = vmax.f32 %v621_v23, 0.0 }
 0x283   : > { %v640_v32 = vpack.c.bf16 %v637_v29, %v636_v31  ;;  %v1199_v29 = vld [vmem:[%s1488_s3 + $0x60] sm:$0xff] }
 0x286   : > { %v623_v18 = vpop.f32.mrf.mxu2 }
 0x287   : > { %v624_v20 = vadd.f32 %v623_v18, %v586_v17  ;;  %v828_v17 = vpop.permute.xlu0 %827 }
 0x289   : > { %v638_v27 = vmax.f32 %v624_v20, 0.0 }
 0x28e   : > { %v625_v22 = vpop.f32.mrf.mxu2 }
 0x28f   : > { %v626_v24 = vadd.f32 %v625_v22, %v591_v21  ;;  %v813_v21 = vpop.permute.xlu1 %812 }
 0x291   : > { %v639_v28 = vmax.f32 %v626_v24, 0.0 }
 0x293   : > { %v641_v30 = vpack.c.bf16 %v639_v28, %v638_v27 }
 0x295   : > { %694 = vmatpush.bf16.msrb.mxu3 %v641_v30  ;;  %v1200_v30 = vld [vmem:[%s1488_s3 + $0x68] sm:$0xff] }
 0x299   : > { %695 = vmatpush.bf16.msrb.mxu3 %v640_v32  ;;  %v892_v32 = vpop.permute.xlu0 %891 }
 0x29c   : > { %1128 = vmatmul.msk.bf16.vlgmr.msrb.gmra.mxu3 %vm444_vm0, %v1193_v33  ;;  %v897_v33 = vpop.permute.xlu1 %896 }
 0x2ac   : > { %1129 = vmatmul.msk.bf16.gmra.mxu3 %vm444_vm0, %v1194_v34 }
 0x31f   : > { %v697_v35 = vpop.f32.mrf.mxu3 }
 0x320   : > { %v698_v46 = vadd.f32 %v697_v35, %v655_v45  ;;  %v902_v35 = vpop.permute.xlu2 %901 }
 0x322   : > { %v715_v51 = vmax.f32 %v698_v46, 0.0 }
 0x327   : > { %v699_v36 = vpop.f32.mrf.mxu3 }
 0x328   : > { %v700_v43 = vadd.f32 %v699_v36, %v660_v41  ;;  %v907_v36 = vpop.permute.xlu0 %906  ;;  %v955_v41 = vpop.permute.xlu1 %954 }
 0x329   : > { %v960_v45 = vpop.permute.xlu2 %959 }
 0x32a   : > { %v716_v49 = vmax.f32 %v700_v43, 0.0 }
 0x32c   : > { %v719_v52 = vpack.c.bf16 %v716_v49, %v715_v51 }
 0x32f   : > { %v702_v38 = vpop.f32.mrf.mxu3 }
 0x330   : > { %v703_v40 = vadd.f32 %v702_v38, %v665_v37 }
 0x332   : > { %v717_v47 = vmax.f32 %v703_v40, 0.0 }
 0x337   : > { %v704_v42 = vpop.f32.mrf.mxu3 }
 0x338   : > { %v705_v44 = vadd.f32 %v704_v42, %v670_v39 }
 0x33a   : > { %v718_v48 = vmax.f32 %v705_v44, 0.0 }
 0x33c   : > { %v720_v50 = vpack.c.bf16 %v718_v48, %v717_v47  ;;  %v965_v47 = vpop.permute.xlu0 %964 }
 0x33e   : > { %773 = vmatpush.bf16.msrb.mxu0 %v720_v50 }
 0x342   : > { %774 = vmatpush.bf16.msrb.mxu0 %v719_v52 }
 0x345   : > { %1146 = vmatmul.msk.bf16.vlgmr.msrb.gmra.mxu0 %vm444_vm0, %v1195_v53 }
 0x355   : > { %1147 = vmatmul.msk.bf16.gmra.mxu0 %vm444_vm0, %v1196_v54  ;;  %v970_v54 = vpop.permute.xlu1 %969 }
 0x3c2   : > { %v776_v55 = vpop.f32.mrf.mxu0 }
 0x3c3   : > { %v777_v2 = vadd.f32 %v776_v55, %v734_v1 }
 0x3c5   : > { %v794_v7 = vmax.f32 %v777_v2, 0.0 }
 0x3ca   : > { %v778_v56 = vpop.f32.mrf.mxu0 }
 0x3cb   : > { %v779_v63 = vadd.f32 %v778_v56, %v739_v61 }
 0x3cd   : > { %v795_v5 = vmax.f32 %v779_v63, 0.0 }
 0x3cf   : > { %v798_v8 = vpack.c.bf16 %v795_v5, %v794_v7 }
 0x3d2   : > { %v781_v58 = vpop.f32.mrf.mxu0 }
 0x3d3   : > { %v782_v60 = vadd.f32 %v781_v58, %v744_v57 }
 0x3d5   : > { %v796_v3 = vmax.f32 %v782_v60, 0.0 }
 0x3da   : > { %v783_v62 = vpop.f32.mrf.mxu0 }
 0x3db   : > { %v784_v0 = vadd.f32 %v783_v62, %v749_v59  ;;  %v989_v62 = vpop.permute.xlu2 %988 }
 0x3dd   : > { %v797_v4 = vmax.f32 %v784_v0, 0.0  ;;  %v991_v0 = vperm.slane %v989_v62, 0 }
 0x3df   : > { %v799_v6 = vpack.c.bf16 %v797_v4, %v796_v3 }
 0x3e1   : > { %852 = vmatpush.bf16.msrb.mxu1 %v799_v6 }
 0x3e5   : > { %853 = vmatpush.bf16.msrb.mxu1 %v798_v8 }
 0x3e8   : > { %1164 = vmatmul.msk.bf16.vlgmr.msrb.gmra.mxu1 %vm444_vm0, %v1197_v9 }
 0x3f8   : > { %1165 = vmatmul.msk.bf16.gmra.mxu1 %vm444_vm0, %v1198_v10 }
 0x465   : > { %v855_v11 = vpop.f32.mrf.mxu1 }
 0x466   : > { %v856_v22 = vadd.f32 %v855_v11, %v813_v21 }
 0x468   : > { %v873_v27 = vmax.f32 %v856_v22, 0.0 }
 0x46d   : > { %v857_v12 = vpop.f32.mrf.mxu1 }
 0x46e   : > { %v858_v19 = vadd.f32 %v857_v12, %v818_v15 }
 0x470   : > { %v874_v25 = vmax.f32 %v858_v19, 0.0 }
 0x472   : > { %v877_v28 = vpack.c.bf16 %v874_v25, %v873_v27 }
 0x475   : > { %v860_v14 = vpop.f32.mrf.mxu1 }
 0x476   : > { %v861_v16 = vadd.f32 %v860_v14, %v823_v13 }
 0x478   : > { %v875_v23 = vmax.f32 %v861_v16, 0.0 }
 0x47d   : > { %v862_v18 = vpop.f32.mrf.mxu1 }
 0x47e   : > { %v863_v20 = vadd.f32 %v862_v18, %v828_v17 }
 0x480   : > { %v876_v24 = vmax.f32 %v863_v20, 0.0 }
 0x482   : > { %v878_v26 = vpack.c.bf16 %v876_v24, %v875_v23 }
 0x484   : > { %931 = vmatpush.bf16.msrb.mxu2 %v878_v26 }
 0x488   : > { %932 = vmatpush.bf16.msrb.mxu2 %v877_v28 }
 0x48b   : > { %1182 = vmatmul.msk.bf16.vlgmr.msrb.gmra.mxu2 %vm444_vm0, %v1199_v29 }
 0x49b   : > { %1183 = vmatmul.msk.bf16.gmra.mxu2 %vm444_vm0, %v1200_v30 }
 0x50e   : > { %v934_v31 = vpop.f32.mrf.mxu2 }
 0x50f   : > { %v935_v39 = vadd.f32 %v934_v31, %v892_v32 }
 0x511   : > { %v944_v43 = vmax.f32 %v935_v39, 0.0 }
 0x513   : > { %v972_v49 = vmul.f32 %v955_v41, %v944_v43 }
 0x516   : > { %v936_v34 = vpop.f32.mrf.mxu2 }
 0x517   : > { %v937_v37 = vadd.f32 %v936_v34, %v897_v33 }
 0x519   : > { %v945_v42 = vmax.f32 %v937_v37, 0.0 }
 0x51b   : > { %v973_v46 = vmul.f32 %v960_v45, %v945_v42 }
 0x51d   : > { %v976_v52 = vadd.f32 %v973_v46, %v972_v49 }
 0x51e   : > { %v939_v38 = vpop.f32.mrf.mxu2 }
 0x51f   : > { %v940_v40 = vadd.f32 %v939_v38, %v902_v35 }
 0x521   : > { %v946_v44 = vmax.f32 %v940_v40, 0.0 }
 0x523   : > { %v974_v50 = vmul.f32 %v965_v47, %v946_v44 }
 0x525   : > { %v977_v55 = vadd.f32 %v976_v52, %v974_v50 }
 0x526   : > { %v941_v48 = vpop.f32.mrf.mxu2 }
 0x527   : > { %v942_v51 = vadd.f32 %v941_v48, %v907_v36 }
 0x529   : > { %v947_v53 = vmax.f32 %v942_v51, 0.0 }
 0x52b   : > { %v975_v56 = vmul.f32 %v970_v54, %v947_v53 }
 0x52d   : > { %v978_v57 = vadd.f32 %v977_v55, %v975_v56 }
 0x52f   : > { %v979_v58 = vrot.slane %v978_v57, 4 }
 0x531   : > { %v980_v59 = vadd.f32 %v979_v58, %v978_v57 }
 0x533   : > { %v981_v60 = vrot.slane %v980_v59, 2 }
 0x535   : > { %v982_v61 = vadd.f32 %v981_v60, %v980_v59 }
 0x537   : > { %v983_v63 = vrot.slane %v982_v61, 1 }
 0x539   : > { %v984_v1 = vadd.f32 %v983_v63, %v982_v61 }
 0x53b   : > { %v992_v2 = vadd.f32 %v991_v0, %v984_v1 }
 0x53d   : > { %v1184_v3 = vmul.f32 -1.442695, %v992_v2 }
 0x53f   : > { %1226 = vpow2.f32 %v1184_v3 }
 0x545   : > { %v1227_v4 = vpop.eup %1226 }
 0x546   : > { %v996_v5 = vadd.f32 1.0, %v1227_v4 }
 0x548   : > { %1228 = vrcp.f32 %v996_v5  ;;  %v1008_v9 = vand.u32 2147483648, %v996_v5  ;;  %v1006_v11 = vand.u32 2147483647, %v996_v5  ;;  %vm1002_vm2 = vweird.f32 %v996_v5 }
 0x54a   : > { %v1009_v13 = vor.u32 1.1754944e-38, %v1008_v9  ;;  %vm1007_vm4 = vcmp.eq.f32.partialorder %v1006_v11, 8.507059e+37 }
 0x54e   : > { %v1229_v6 = vpop.eup %1228 }
 0x54f   : > { %v998_v7 = vmul.f32 %v1229_v6, %v996_v5  ;;  %vm1003_vm1 = vweird.f32 %v1229_v6 }
 0x550   : > { %vm1004_vm3 = vmor %vm1002_vm2, %vm1003_vm1 }
 0x551   : > { %v999_v8 = vsub.f32 1.0, %v998_v7 }
 0x553   : > { %v1000_v10 = vmul.f32 %v1229_v6, %v999_v8 }
 0x555   : > { %v1001_v12 = vadd.f32 %v1229_v6, %v1000_v10 }
 0x557   : > { %v1005_v14 = vsel %vm1004_vm3, %v1229_v6, %v1001_v12 }
 0x558   : > { %v1010_v15 = vsel %vm1007_vm4, %v1009_v13, %v1005_v14 }
 0x559   : > { %1012 = vst [vmem:[%s273_s8] sm:$0x1] %v1010_v15 }
 0x55a PF: > { %s19_s26 = sadd.s32 1, %s1236_s26  }
 0x55b   : > { %p16_p4 = scmp.ge.s32.totalorder %s19_s26, 4  }
 0x55d   :  { %18 = sbr.rel (!%p16_p4) target bundleno = 3 (0x3), region = 90 }

</bundles_post_ra>
